<compile_context>
chip_gen: v7x
topology: tpu7x:2x2x1
jax: 0.10.0
libtpu: 0.0.40
codegen_flags: <defaults>
</compile_context>

<pallas_src>
import functools
import math

import jax
import jax.numpy as jnp
from jax.experimental import pallas as pl
from jax.experimental.pallas import tpu as pltpu

_VMEM_LIMIT = 32 * 1024 * 1024    # fits scoped-VMEM budgets on v5e/v6e/v7x
_DTYPE = jnp.bfloat16             # activation/weight dtype (f32 accumulation in-kernel)


def _pick_tile(dim, prefs):
    """Largest preferred tile that divides `dim`; fall back to the full axis."""
    for p in prefs:
        if dim >= p and dim % p == 0:
            return p
    return dim   # full axis: always a legal block shape


# --------------------------------------------------------------------------
# Fused linear kernel:  out = [LN](act(x @ w + b) + residual)
# --------------------------------------------------------------------------

def _linear_kernel(x_ref, w_ref, *rest, activation, has_bias, has_residual,
                   has_ln, ln_eps):
    refs = list(rest)
    acc_ref = refs.pop()          # scratch (f32 accumulator)
    o_ref = refs.pop()            # output
    i = 0
    b_ref = refs[i] if has_bias else None
    i += int(has_bias)
    r_ref = refs[i] if has_residual else None
    i += int(has_residual)
    g_ref = refs[i] if has_ln else None
    bb_ref = refs[i + 1] if has_ln else None

    @pl.when(pl.program_id(2) == 0)
    def _():
        acc_ref[...] = jnp.zeros_like(acc_ref)

    acc_ref[...] += jnp.dot(x_ref[...], w_ref[...],
                            preferred_element_type=jnp.float32)

    @pl.when(pl.program_id(2) == pl.num_programs(2) - 1)
    def _():
        acc = acc_ref[...]
        if has_bias:
            acc = acc + b_ref[...].astype(jnp.float32)
        if activation == "gelu":        # exact erf GELU (f32 epilogue)
            acc = 0.5 * acc * (1.0 + jax.lax.erf(acc * 0.7071067811865476))
        elif activation == "relu":
            acc = jnp.maximum(acc, 0.0)
        if has_residual:
            acc = acc + r_ref[...].astype(jnp.float32)
        if has_ln:
            mu = jnp.mean(acc, axis=-1, keepdims=True)
            var = jnp.mean(jnp.square(acc - mu), axis=-1, keepdims=True)
            acc = (acc - mu) * jax.lax.rsqrt(var + ln_eps)
            acc = acc * g_ref[...].astype(jnp.float32) + bb_ref[...].astype(jnp.float32)
        o_ref[...] = acc.astype(o_ref.dtype)


def linear(x, w, b=None, *, activation=None, residual=None, ln=None,
           out_dtype=None):
    """x: [..., K] @ w: [K, N] (+bias, +activation, +residual, +fused LayerNorm)."""
    orig_shape = x.shape
    K = orig_shape[-1]
    M = int(math.prod(orig_shape[:-1]))
    N = w.shape[-1]
    out_dtype = out_dtype or x.dtype

    tm = _pick_tile(M, (256, 128, 64, 32, 16, 8))
    tk = _pick_tile(K, (512, 256, 128))
    # fused LN needs the whole feature row in one output block
    tn = N if ln is not None else _pick_tile(N, (512, 256, 128))

    args = [x.reshape(M, K), w]
    in_specs = [pl.BlockSpec((tm, tk), lambda i, j, k: (i, k)),
                pl.BlockSpec((tk, tn), lambda i, j, k: (k, j))]
    if b is not None:
        args.append(b.reshape(1, N))
        in_specs.append(pl.BlockSpec((1, tn), lambda i, j, k: (0, j)))
    if residual is not None:
        args.append(residual.reshape(M, N))
        in_specs.append(pl.BlockSpec((tm, tn), lambda i, j, k: (i, j)))
    if ln is not None:
        gamma, beta, eps = ln
        args += [gamma.reshape(1, N), beta.reshape(1, N)]
        in_specs += [pl.BlockSpec((1, tn), lambda i, j, k: (0, j)),
                     pl.BlockSpec((1, tn), lambda i, j, k: (0, j))]
    else:
        eps = 0.0

    out = pl.pallas_call(
        functools.partial(_linear_kernel, activation=activation,
                          has_bias=b is not None,
                          has_residual=residual is not None,
                          has_ln=ln is not None, ln_eps=float(eps)),
        grid=(M // tm, N // tn, K // tk),
        in_specs=in_specs,
        out_specs=pl.BlockSpec((tm, tn), lambda i, j, k: (i, j)),
        out_shape=jax.ShapeDtypeStruct((M, N), out_dtype),
        scratch_shapes=[pltpu.VMEM((tm, tn), jnp.float32)],
        compiler_params=pltpu.CompilerParams(
            dimension_semantics=("parallel", "parallel", "arbitrary"),
            vmem_limit_bytes=_VMEM_LIMIT),
    )(*args)
    return out.reshape(orig_shape[:-1] + (N,))


# --------------------------------------------------------------------------
# Row-tiled LayerNorm
# --------------------------------------------------------------------------

def _layernorm_kernel(x_ref, g_ref, b_ref, o_ref, *, eps):
    x = x_ref[...].astype(jnp.float32)
    mu = jnp.mean(x, axis=-1, keepdims=True)
    var = jnp.mean(jnp.square(x - mu), axis=-1, keepdims=True)
    y = (x - mu) * jax.lax.rsqrt(var + eps)
    o_ref[...] = (y * g_ref[...].astype(jnp.float32)
                  + b_ref[...].astype(jnp.float32)).astype(o_ref.dtype)


def layernorm(x, gamma, beta, eps):
    orig_shape = x.shape
    D = orig_shape[-1]
    M = int(math.prod(orig_shape[:-1]))
    tm = _pick_tile(M, (512, 256, 128, 64, 32, 16, 8))
    out = pl.pallas_call(
        functools.partial(_layernorm_kernel, eps=float(eps)),
        grid=(M // tm,),
        in_specs=[pl.BlockSpec((tm, D), lambda i: (i, 0)),
                  pl.BlockSpec((1, D), lambda i: (0, 0)),
                  pl.BlockSpec((1, D), lambda i: (0, 0))],
        out_specs=pl.BlockSpec((tm, D), lambda i: (i, 0)),
        out_shape=jax.ShapeDtypeStruct((M, D), x.dtype),
        compiler_params=pltpu.CompilerParams(
            dimension_semantics=("parallel",), vmem_limit_bytes=_VMEM_LIMIT),
    )(x.reshape(M, D), gamma.reshape(1, D), beta.reshape(1, D))
    return out.reshape(orig_shape)


# --------------------------------------------------------------------------
# Multi-head attention: all heads of one batch element per grid step
# --------------------------------------------------------------------------

def _mha_kernel(q_ref, k_ref, v_ref, *rest, scale, has_mask):
    if has_mask:
        m_ref, o_ref = rest
    else:
        (o_ref,) = rest
    q = q_ref[0]                      # (H, T, dh) bf16
    k = k_ref[0]                      # (H, S, dh)
    v = v_ref[0]                      # (H, S, dh)
    s = jnp.einsum('htd,hsd->hts', q, k,
                   preferred_element_type=jnp.float32) * scale
    if has_mask:
        s = s + m_ref[0]              # (1, S) additive key mask, broadcast
    s = s - jnp.max(s, axis=-1, keepdims=True)
    p = jnp.exp(s)
    denom = jnp.sum(p, axis=-1, keepdims=True)
    p = p * pl.reciprocal(denom, approx=True)          # EUP slot
    o = jnp.einsum('hts,hsd->htd', p.astype(v.dtype), v,
                   preferred_element_type=jnp.float32)
    o_ref[0] = o.astype(o_ref.dtype)


def mha(q, k, v, additive_mask, scale):
    """q: [B,H,T,dh], k/v: [B,H,S,dh], additive_mask: [B,S] or None -> [B,H,T,dh]."""
    B, H, T, dh = q.shape
    S = k.shape[2]
    has_mask = additive_mask is not None
    in_specs = [pl.BlockSpec((1, H, T, dh), lambda b: (b, 0, 0, 0)),
                pl.BlockSpec((1, H, S, dh), lambda b: (b, 0, 0, 0)),
                pl.BlockSpec((1, H, S, dh), lambda b: (b, 0, 0, 0))]
    args = [q, k, v]
    if has_mask:
        in_specs.append(pl.BlockSpec((1, 1, S), lambda b: (b, 0, 0)))
        args.append(additive_mask.reshape(B, 1, S).astype(jnp.float32))
    return pl.pallas_call(
        functools.partial(_mha_kernel, scale=float(scale), has_mask=has_mask),
        grid=(B,),
        in_specs=in_specs,
        out_specs=pl.BlockSpec((1, H, T, dh), lambda b: (b, 0, 0, 0)),
        out_shape=jax.ShapeDtypeStruct((B, H, T, dh), q.dtype),
        compiler_params=pltpu.CompilerParams(
            dimension_semantics=("parallel",), vmem_limit_bytes=_VMEM_LIMIT),
    )(*args)


# --------------------------------------------------------------------------
# Fused vocab projection + per-row cross-entropy (tiled over vocab, online LSE)
# --------------------------------------------------------------------------

def _vocab_ce_kernel(x_ref, w_ref, lab_ref, pred_ref, nll_ref,
                     m_sc, l_sc, pick_sc, *, tv):
    v = pl.program_id(1)

    @pl.when(v == 0)
    def _():
        m_sc[...] = jnp.full_like(m_sc, -jnp.inf)
        l_sc[...] = jnp.zeros_like(l_sc)
        pick_sc[...] = jnp.zeros_like(pick_sc)

    # TODO(synk): K (=hidden dim, <=768) is kept as one block; add a K-grid axis
    #             if the hidden size ever exceeds what comfortably fits in VMEM.
    logits = jnp.dot(x_ref[...], w_ref[...], preferred_element_type=jnp.float32)
    pred_ref[...] = logits                                   # (tm, tv) f32

    blk_max = jnp.max(logits, axis=-1, keepdims=True)
    m_new = jnp.maximum(m_sc[...], blk_max)
    l_sc[...] = (l_sc[...] * jnp.exp(m_sc[...] - m_new)
                 + jnp.sum(jnp.exp(logits - m_new), axis=-1, keepdims=True))
    m_sc[...] = m_new
    col = jax.lax.broadcasted_iota(jnp.int32, logits.shape, 1) + v * tv
    onehot = (col == lab_ref[...]).astype(logits.dtype)
    pick_sc[...] = pick_sc[...] + jnp.sum(logits * onehot, axis=-1, keepdims=True)

    @pl.when(v == pl.num_programs(1) - 1)
    def _():
        nll_ref[...] = m_sc[...] + jnp.log(l_sc[...]) - pick_sc[...]


def vocab_projection_ce(hidden, w_t, labels):
    """hidden: [M, D] bf16, w_t: [D, V] bf16, labels: [M] -> (logits [M,V] f32, nll [M,1] f32)."""
    M, K = hidden.shape
    V = w_t.shape[-1]
    tm = _pick_tile(M, (256, 128, 64, 32, 16, 8))
    tv = _pick_tile(V, (1024, 512, 256, 128))
    pred, nll = pl.pallas_call(
        functools.partial(_vocab_ce_kernel, tv=tv),
        grid=(M // tm, V // tv),
        in_specs=[pl.BlockSpec((tm, K), lambda i, v: (i, 0)),
                  pl.BlockSpec((K, tv), lambda i, v: (0, v)),
                  pl.BlockSpec((tm, 1), lambda i, v: (i, 0))],
        out_specs=[pl.BlockSpec((tm, tv), lambda i, v: (i, v)),
                   pl.BlockSpec((tm, 1), lambda i, v: (i, 0))],
        out_shape=(jax.ShapeDtypeStruct((M, V), jnp.float32),
                   jax.ShapeDtypeStruct((M, 1), jnp.float32)),
        scratch_shapes=[pltpu.VMEM((tm, 1), jnp.float32)] * 3,
        compiler_params=pltpu.CompilerParams(
            dimension_semantics=("parallel", "arbitrary"),
            vmem_limit_bytes=_VMEM_LIMIT),
    )(hidden, w_t, labels.reshape(M, 1).astype(jnp.int32))
    return pred, nll


# --------------------------------------------------------------------------
# Model building blocks (parameter plumbing in plain JAX, compute in kernels)
# --------------------------------------------------------------------------

def _split_heads(x, H):
    B, T, D = x.shape
    return x.reshape(B, T, H, D // H).transpose(0, 2, 1, 3)


def _merge_heads(x):
    B, H, T, dh = x.shape
    return x.transpose(0, 2, 1, 3).reshape(B, T, H * dh)


def vit_block(x, p, num_heads):
    B, T, D = x.shape
    dh = D // num_heads
    h = layernorm(x, p['norm1_g'], p['norm1_b'], 1e-6)
    qkv = linear(h, p['qkv_w'], p['qkv_b'])                       # [B, T, 3D]
    qkv = qkv.reshape(B, T, 3, num_heads, dh).transpose(2, 0, 3, 1, 4)
    q, k, v = qkv[0], qkv[1], qkv[2]                              # [B, H, T, dh]
    ctx = _merge_heads(mha(q, k, v, None, dh ** -0.5))            # no mask for ViT
    x = linear(ctx, p['proj_w'], p['proj_b'], residual=x)         # fused residual
    h = layernorm(x, p['norm2_g'], p['norm2_b'], 1e-6)
    h = linear(h, p['fc1_w'], p['fc1_b'], activation="gelu")
    x = linear(h, p['fc2_w'], p['fc2_b'], residual=x)             # fused residual
    return x


def vit_forward(p, image):
    # NCHW input; non-overlapping patches -> im2col -> tiled matmul.
    B, C, H, W = image.shape
    ps = p['patch_size']
    gh, gw = H // ps, W // ps
    patches = image.reshape(B, C, gh, ps, gw, ps)
    patches = patches.transpose(0, 2, 4, 1, 3, 5).reshape(B, gh * gw, C * ps * ps)
    x = linear(patches.astype(_DTYPE), p['patch_w'], p['patch_b'])  # [B, N, D]
    cls = jnp.broadcast_to(p['cls_token'], (B, 1, x.shape[-1]))
    x = jnp.concatenate([cls, x], axis=1)
    x = x + p['pos_embed'][:, : x.shape[1]]
    for blk in p['blocks']:
        x = vit_block(x, blk, p['num_heads'])
    x = layernorm(x, p['norm_g'], p['norm_b'], 1e-6)
    return x                                                      # [B, 1+N, D]


def bert_layer(x, enc, self_mask_add, cross_mask_add, p, num_heads):
    B, T, D = x.shape
    dh = D // num_heads
    scale = dh ** -0.5
    # self-attention (+ fused residual + LN in the output projection)
    q = _split_heads(linear(x, p['sa_q_w'], p['sa_q_b']), num_heads)
    k = _split_heads(linear(x, p['sa_k_w'], p['sa_k_b']), num_heads)
    v = _split_heads(linear(x, p['sa_v_w'], p['sa_v_b']), num_heads)
    ctx = _merge_heads(mha(q, k, v, self_mask_add, scale))
    x = linear(ctx, p['sa_o_w'], p['sa_o_b'], residual=x,
               ln=(p['sa_ln_g'], p['sa_ln_b'], 1e-12))
    # cross-attention to image embeddings
    q = _split_heads(linear(x, p['ca_q_w'], p['ca_q_b']), num_heads)
    k = _split_heads(linear(enc, p['ca_k_w'], p['ca_k_b']), num_heads)
    v = _split_heads(linear(enc, p['ca_v_w'], p['ca_v_b']), num_heads)
    ctx = _merge_heads(mha(q, k, v, cross_mask_add, scale))
    x = linear(ctx, p['ca_o_w'], p['ca_o_b'], residual=x,
               ln=(p['ca_ln_g'], p['ca_ln_b'], 1e-12))
    # feed-forward (+ fused residual + LN)
    h = linear(x, p['ffn_i_w'], p['ffn_i_b'], activation="gelu")
    x = linear(h, p['ffn_o_w'], p['ffn_o_b'], residual=x,
               ln=(p['ffn_ln_g'], p['ffn_ln_b'], 1e-12))
    return x


def bert_forward(p, input_ids, attention_mask, enc_hidden, enc_atts):
    B, L = input_ids.shape
    emb = (p['word_emb'][input_ids]
           + p['pos_emb'][:L][None, :, :]
           + p['type_emb'][0][None, None, :])
    x = layernorm(emb, p['emb_ln_g'], p['emb_ln_b'], 1e-12)
    self_mask = (1.0 - attention_mask.astype(jnp.float32)) * -10000.0   # [B, L]
    cross_mask = (1.0 - enc_atts.astype(jnp.float32)) * -10000.0        # [B, S_img]
    for lyr in p['layers']:
        x = bert_layer(x, enc_hidden, self_mask, cross_mask, lyr, p['num_heads'])
    return x                                                            # last_hidden_state


# --------------------------------------------------------------------------
# ALBEF.forward
# --------------------------------------------------------------------------

def albef_forward(params, image, text, targets, input_ids, attention_mask,
                  prompt_label_idx, labels, alpha=0.0, train=True):
    del text, targets, alpha  # unused in the non-distill forward path
    image_embeds = vit_forward(params['visual'], image)                 # [B, S_img, D]
    B_img, S_img, _ = image_embeds.shape
    image_atts = jnp.ones((B_img, S_img), jnp.int32)

    last_hidden = bert_forward(params['text'], input_ids, attention_mask,
                               image_embeds, image_atts)                # [B, L, D]

    B, Pn = prompt_label_idx.shape
    gathered = last_hidden[jnp.arange(B)[:, None], prompt_label_idx]    # [B, Pn, D]
    gathered = gathered.reshape(B * Pn, last_hidden.shape[-1])
    w_t = params['text']['word_emb_t']                                  # [D, V], stored once

    if not train:
        return linear(gathered, w_t, out_dtype=jnp.float32)             # [B*Pn, V]

    labels_flat = labels.squeeze(1)
    prediction, per_row_nll = vocab_projection_ce(gathered, w_t, labels_flat)
    loss = jnp.mean(per_row_nll)
    return loss, prediction


# --------------------------------------------------------------------------
# Deterministic parameter initialization (shapes implied by __init__)
# --------------------------------------------------------------------------

def init_albef_params(key, cfg):
    keys = iter(jax.random.split(key, 1024))

    def W(*shape):
        return (jax.random.normal(next(keys), shape, jnp.float32) * 0.02).astype(_DTYPE)

    def Z(*shape):
        return jnp.zeros(shape, _DTYPE)

    def O(*shape):
        return jnp.ones(shape, _DTYPE)

    Dv, C, ps = cfg['vis_dim'], 3, cfg['patch_size']
    npatch = (cfg['image_res'] // ps) ** 2
    vis_blocks = []
    for _ in range(cfg['vis_depth']):
        vis_blocks.append(dict(
            norm1_g=O(Dv), norm1_b=Z(Dv),
            qkv_w=W(Dv, 3 * Dv), qkv_b=Z(3 * Dv),
            proj_w=W(Dv, Dv), proj_b=Z(Dv),
            norm2_g=O(Dv), norm2_b=Z(Dv),
            fc1_w=W(Dv, 4 * Dv), fc1_b=Z(4 * Dv),
            fc2_w=W(4 * Dv, Dv), fc2_b=Z(Dv),
        ))
    visual = dict(
        patch_size=ps, num_heads=cfg['vis_heads'],
        patch_w=W(C * ps * ps, Dv), patch_b=Z(Dv),
        cls_token=W(1, 1, Dv), pos_embed=W(1, npatch + 1, Dv),
        blocks=vis_blocks, norm_g=O(Dv), norm_b=Z(Dv),
    )

    Dt, I, V = cfg['hidden'], cfg['intermediate'], cfg['vocab']
    layers = []
    for _ in range(cfg['text_layers']):
        layers.append(dict(
            sa_q_w=W(Dt, Dt), sa_q_b=Z(Dt), sa_k_w=W(Dt, Dt), sa_k_b=Z(Dt),
            sa_v_w=W(Dt, Dt), sa_v_b=Z(Dt), sa_o_w=W(Dt, Dt), sa_o_b=Z(Dt),
            sa_ln_g=O(Dt), sa_ln_b=Z(Dt),
            ca_q_w=W(Dt, Dt), ca_q_b=Z(Dt), ca_k_w=W(Dv, Dt), ca_k_b=Z(Dt),
            ca_v_w=W(Dv, Dt), ca_v_b=Z(Dt), ca_o_w=W(Dt, Dt), ca_o_b=Z(Dt),
            ca_ln_g=O(Dt), ca_ln_b=Z(Dt),
            ffn_i_w=W(Dt, I), ffn_i_b=Z(I),
            ffn_o_w=W(I, Dt), ffn_o_b=Z(Dt),
            ffn_ln_g=O(Dt), ffn_ln_b=Z(Dt),
        ))
    word_emb = W(V, Dt)
    text = dict(
        num_heads=cfg['text_heads'],
        word_emb=word_emb, word_emb_t=word_emb.T,          # pre-transposed once
        pos_emb=W(cfg['max_pos'], Dt), type_emb=W(2, Dt),
        emb_ln_g=O(Dt), emb_ln_b=Z(Dt),
        layers=layers,
    )
    # cls_head exists in __init__ but is never used in forward()
    cls_head = dict(w1=W(Dt, Dt), b1=Z(Dt), w2=W(Dt, Dt), b2=Z(Dt))
    return dict(visual=visual, text=text, cls_head=cls_head)


# --------------------------------------------------------------------------
# Main
# --------------------------------------------------------------------------

if __name__ == "__main__":
    cfg = dict(image_res=32, patch_size=16, vis_dim=32, vis_depth=2, vis_heads=4,
               hidden=32, text_layers=2, text_heads=4, intermediate=128,
               vocab=100, max_pos=64, distill=False)

    root = jax.random.PRNGKey(0)
    pk, ik, tk, lk = jax.random.split(root, 4)
    params = init_albef_params(pk, cfg)

    B, L, Pn = 2, 8, 2
    image = jax.random.normal(ik, (B, 3, cfg['image_res'], cfg['image_res']), jnp.float32)
    input_ids = jax.random.randint(tk, (B, L), 0, cfg['vocab'], dtype=jnp.int32)
    attention_mask = jnp.ones((B, L), jnp.int32).at[1, 6:].set(0)
    prompt_label_idx = jnp.array([[1, 3], [2, 5]], dtype=jnp.int32)
    labels = jax.random.randint(lk, (B * Pn, 1), 0, cfg['vocab'], dtype=jnp.int32)
    text = None                                   # unused by forward()
    targets = jnp.zeros((B,), jnp.int32)          # unused by forward()

    loss, prediction = albef_forward(params, image, text, targets, input_ids,
                                     attention_mask, prompt_label_idx, labels,
                                     alpha=0.0, train=True)
    jax.block_until_ready((loss, prediction))
    assert prediction.shape == (B * Pn, cfg['vocab'])
    assert loss.shape == ()
    assert bool(jnp.isfinite(loss))
    print("KERNEL_OK")
</pallas_src>

<mosaic_0001>
module attributes {stable_mosaic.version = 11 : i64} {
  func.func @_linear_kernel(%arg0: i32, %arg1: i32, %arg2: i32, %arg3: memref<8x256xbf16, #tpu.memory_space<vmem>>, %arg4: memref<256x32xbf16, #tpu.memory_space<vmem>>, %arg5: memref<1x32xbf16, #tpu.memory_space<vmem>>, %arg6: memref<8x32xbf16, #tpu.memory_space<vmem>>, %arg7: memref<8x32xf32, #tpu.memory_space<vmem>>) attributes {dimension_semantics = [#tpu.dimension_semantics<parallel>, #tpu.dimension_semantics<parallel>, #tpu.dimension_semantics<arbitrary>], iteration_bounds = array<i64: 1, 1, 3>, scalar_prefetch = 0 : i64, scratch_operands = 1 : i64, tpu.core_type = #tpu.core_type<tc>, window_params = [{transform_indices = @transform_0, window_bounds = array<i64: 8, 256>}, {transform_indices = @transform_1, window_bounds = array<i64: 256, 32>}, {transform_indices = @transform_2, window_bounds = array<i64: 1, 32>}, {transform_indices = @transform_3, window_bounds = array<i64: 8, 32>}]} {
    %c0_i32 = arith.constant 0 : i32
    %0 = arith.cmpi eq, %arg2, %c0_i32 : i32
    %1 = arith.extui %0 : i1 to i32
    %c0_i32_0 = arith.constant 0 : i32
    %2 = arith.cmpi ne, %1, %c0_i32_0 : i32
    scf.if %2 {
      %cst_9 = arith.constant 0.000000e+00 : f32
      %12 = vector.broadcast %cst_9 : f32 to vector<8x32xf32>
      %c0_10 = arith.constant 0 : index
      %c0_11 = arith.constant 0 : index
      %13 = vector.load %arg7[%c0_10, %c0_11] : memref<8x32xf32, #tpu.memory_space<vmem>>, vector<8x32xf32>
      tpu.vector_store %arg7[%c0_10, %c0_11], %12 {strides = array<i32>} : memref<8x32xf32, #tpu.memory_space<vmem>>, vector<8x32xf32>,
    } else {
    }
    %c0 = arith.constant 0 : index
    %c0_1 = arith.constant 0 : index
    %3 = vector.load %arg7[%c0, %c0_1] : memref<8x32xf32, #tpu.memory_space<vmem>>, vector<8x32xf32>
    %c0_2 = arith.constant 0 : index
    %c0_3 = arith.constant 0 : index
    %4 = vector.load %arg3[%c0_2, %c0_3] : memref<8x256xbf16, #tpu.memory_space<vmem>>, vector<8x256xbf16>
    %c0_4 = arith.constant 0 : index
    %c0_5 = arith.constant 0 : index
    %5 = vector.load %arg4[%c0_4, %c0_5] : memref<256x32xbf16, #tpu.memory_space<vmem>>, vector<256x32xbf16>
    %cst = arith.constant dense<0.000000e+00> : vector<8x32xf32>
    %6 = tpu.matmul %4, %5, %cst {dimension_numbers = #tpu.dot_dimension_numbers<[1], [0], [0], [1], [0, 0, 1, 1], [], []>} : vector<8x256xbf16>, vector<256x32xbf16>, vector<8x32xf32> -> vector<8x32xf32>
    %7 = arith.addf %3, %6 : vector<8x32xf32>
    %c0_6 = arith.constant 0 : index
    %c0_7 = arith.constant 0 : index
    %8 = vector.load %arg7[%c0_6, %c0_7] : memref<8x32xf32, #tpu.memory_space<vmem>>, vector<8x32xf32>
    tpu.vector_store %arg7[%c0_6, %c0_7], %7 {strides = array<i32>} : memref<8x32xf32, #tpu.memory_space<vmem>>, vector<8x32xf32>,
    %c2_i32 = arith.constant 2 : i32
    %9 = arith.cmpi eq, %arg2, %c2_i32 : i32
    %10 = arith.extui %9 : i1 to i32
    %c0_i32_8 = arith.constant 0 : i32
    %11 = arith.cmpi ne, %10, %c0_i32_8 : i32
    scf.if %11 {
      %c0_9 = arith.constant 0 : index
      %c0_10 = arith.constant 0 : index
      %12 = vector.load %arg7[%c0_9, %c0_10] : memref<8x32xf32, #tpu.memory_space<vmem>>, vector<8x32xf32>
      %c0_11 = arith.constant 0 : index
      %c0_12 = arith.constant 0 : index
      %13 = vector.load %arg5[%c0_11, %c0_12] : memref<1x32xbf16, #tpu.memory_space<vmem>>, vector<1x32xbf16>
      %14 = arith.extf %13 : vector<1x32xbf16> to vector<1x32xf32>
      %15 = vector.broadcast %14 : vector<1x32xf32> to vector<8x32xf32>
      %16 = arith.addf %12, %15 : vector<8x32xf32>
      %17 = arith.truncf %16 : vector<8x32xf32> to vector<8x32xbf16>
      %c0_13 = arith.constant 0 : index
      %c0_14 = arith.constant 0 : index
      %18 = vector.load %arg6[%c0_13, %c0_14] : memref<8x32xbf16, #tpu.memory_space<vmem>>, vector<8x32xbf16>
      tpu.vector_store %arg6[%c0_13, %c0_14], %17 {strides = array<i32>} : memref<8x32xbf16, #tpu.memory_space<vmem>>, vector<8x32xbf16>,
    } else {
    }
    return
  }
  func.func @transform_0(%arg0: i32, %arg1: i32, %arg2: i32) -> (i32, i32) {
    %c0_i32 = arith.constant 0 : i32
    return %arg0, %arg2 : i32, i32
  }
  func.func @transform_1(%arg0: i32, %arg1: i32, %arg2: i32) -> (i32, i32) {
    %c0_i32 = arith.constant 0 : i32
    return %arg2, %arg1 : i32, i32
  }
  func.func @transform_2(%arg0: i32, %arg1: i32, %arg2: i32) -> (i32, i32) {
    %c0_i32 = arith.constant 0 : i32
    %c0_i32_0 = arith.constant 0 : i32
    return %c0_i32, %arg1 : i32, i32
  }
  func.func @transform_3(%arg0: i32, %arg1: i32, %arg2: i32) -> (i32, i32) {
    %c0_i32 = arith.constant 0 : i32
    return %arg0, %arg1 : i32, i32
  }
}

</mosaic_0001>

<bundles_post_ra>
// kernel: tpu_custom_call.1
= control target key start
LH: loop header
LB: loop body
LE: loop exit
PB: predicated region body
PF: predicated region fallthrough
CT: control target
= control target key end

     0   :  { %8 = vsyncpa [#allocation4], 0  ;;  %s726_s12 = smov 0   ;;  %s728_s13 = smov 0   ;;  %s815_s0 = inlined_call_operand.vmem [shape: bf16[8,768], index: 0, kind: input, shape index: {}]   ;;  %s816_s1 = inlined_call_operand.vmem [shape: bf16[768,32], index: 1, kind: input, shape index: {}]   ;;  %s817_s2 = inlined_call_operand.vmem [shape: bf16[1,32], index: 2, kind: input, shape index: {}]   ;;  %s818_s3 = inlined_call_operand.hbm [shape: bf16[8,32], index: 3, kind: output, shape index: {}]  }
   0x1   :  { %s730_s14 = smov 0  }
   0x2 LB: > { %s545_s15 = sadd.s32 4294967295, %s702_s14   ;;  %s26_s16 = sadd.s32 1, %s698_s13  ;;  %s702_s14 = sphi %s730_s14, %s14_s14   ;;  %s698_s13 = sphi %s728_s13, %s821_s13   ;;  %s694_s12 = sphi %s726_s12, %s820_s12  }
   0x3   : > { %p27_p0 = scmp.ge.s32.totalorder %s26_s16, 3  ;;  %p549_p1 = scmp.ge.s32.totalorder %s702_s14, 1 }
   0x4   : > { %p190_p2 = scmp.lt.s32.totalorder %s702_s14, 4 }
   0x5   : > { %s823_s16 = smov (%p27_p0, %s26_s16), 0 }
   0x6   : > { %p191_p3 = pnand %p549_p1, %p190_p2 }
   0x7   : > { %s550_s17 = sshll.u32 (!%p191_p3), %s694_s12, 1  ;;  %s552_s18 = sshll.u32 (!%p191_p3), %s694_s12, 5 }
   0x8   : > { %194 = sbr.rel (%p191_p3) target bundleno = 313 (0x139), region = 32  ;;  %p227_p4 = scmp.lt.s32.totalorder (!%p191_p3), %s550_s17, 5 }
   0x9   : > { %p235_p5 = scmp.lt.s32.totalorder (!%p191_p3), %s552_s18, 95  ;;  %p554_p6 = scmp.ne.s32.totalorder (!%p191_p3), %s694_s12, 0 }
   0xf   : > { %s825_s17 = smov (!%p227_p4, %s550_s17), 5  ;;  %s827_s18 = smov (!%p235_p5, %s552_s18), 95 }
  0x10   : > { %s551_s19 = sshll.u32 %s825_s17, 2  ;;  %s553_s23 = sshll.u32 %s827_s18, 2  ;;  %vm251_vm0 = vcmask (!%p554_p6), 261120   ;;  %v704_v0 = vmov (!%p554_p6), 0.0  }
  0x11   : > { %s232_s22 = scalar_lea.vmem %s815_s0, %s551_s19  ;;  %s755_s26 = scalar_lea.vmem %s816_s1, %s553_s23  ;;  %252 = vst.msk [vmem:[#allocation2] sm:$0xff] (!%p554_p6), %vm251_vm0, %v704_v0 }
  0x12   : > { %250 = sbr.rel (%p554_p6) target bundleno = 25 (0x19), region = 36 }
  0x19 PF: > { %v632_v1 = vld [vmem:[%s755_s26 + $0x40] sm:$0xff]   ;;  %v634_v3 = vld [vmem:[%s755_s26 + $0x48] sm:$0xff]   ;;  %v636_v5 = vld [vmem:[%s755_s26 + $0x50] sm:$0xff]   ;;  %vm431_vm1 = vcmask 261120   ;;  %p573_p7 = scmp.ne.s32.totalorder %s694_s12, 2 }
  0x1a   : > { %v633_v2 = vld [vmem:[%s755_s26] sm:$0xff]   ;;  %578 = vmatprep.subr.bf16.mxu0 %v632_v1  ;;  %v635_v4 = vld [vmem:[%s755_s26 + $0x8] sm:$0xff]   ;;  %v637_v6 = vld [vmem:[%s755_s26 + $0x10] sm:$0xff]   ;;  %v440_v28 = vlaneseq (!%p573_p7)  ;;  %vm446_vm2 = vcmask (!%p573_p7), 257024  }
  0x1b   : > { %579 = vmatpush3.bf16.msra.mxu0 %v633_v2  ;;  %v638_v7 = vld [vmem:[%s755_s26 + $0x58] sm:$0xff]   ;;  %v640_v9 = vld [vmem:[%s755_s26 + $0x60] sm:$0xff]   ;;  %v642_v11 = vld [vmem:[%s755_s26 + $0x68] sm:$0xff]  }
  0x1c   : > { %580 = vmatprep.subr.bf16.mxu0 %v634_v3  ;;  %v639_v8 = vld [vmem:[%s755_s26 + $0x18] sm:$0xff]   ;;  %v641_v10 = vld [vmem:[%s755_s26 + $0x20] sm:$0xff]   ;;  %v643_v14 = vld [vmem:[%s755_s26 + $0x28] sm:$0xff]   ;;  %v441_v30 = vshrl.u32 (!%p573_p7), %v440_v28, 7 }
  0x1d   : > { %v254_v12 = vld [vmem:[%s232_s22] sm:$0xff]  ;;  %v644_v15 = vld [vmem:[%s755_s26 + $0x70] sm:$0xff]   ;;  %v646_v17 = vld [vmem:[%s755_s26 + $0x78] sm:$0xff]  }
  0x1e   : > { %v556_v13 = vcombine.high %v254_v12, %v254_v12  ;;  %v645_v16 = vld [vmem:[%s755_s26 + $0x30] sm:$0xff]   ;;  %v647_v18 = vld [vmem:[%s755_s26 + $0x38] sm:$0xff]   ;;  %v555_v19 = vcombine.low %v254_v12, %v254_v12  ;;  %v253_v21 = vld [vmem:[#allocation2] sm:$0xff]  ;;  %v442_v31 = vsub.s32 (!%p573_p7), 0, %v441_v30 }
  0x1f   : > { %581 = vmatpush3.bf16.msra.mxu0 %v635_v4  ;;  %v438_v27 = vld [vmem:[%s817_s2] sm:$0x1] (!%p573_p7) }
  0x20   : > { %582 = vmatprep.subr.bf16.mxu0 %v636_v5  ;;  %422 = vmatprep.mubr.bf16.mxu0 %v556_v13  ;;  %v439_v29 = vunpack.c.l.bf16 (!%p573_p7), %v438_v27 }
  0x22   : > { %v443_v33 = vrot.slane (!%p573_p7), %v439_v29, %v442_v31 }
  0x23   : > { %583 = vmatpush3.bf16.msra.mxu0 %v637_v6 }
  0x24   : > { %584 = vmatprep.subr.bf16.mxu0 %v638_v7 }
  0x27   : > { %585 = vmatpush3.bf16.msra.mxu0 %v639_v8 }
  0x28   : > { %586 = vmatprep.subr.bf16.mxu0 %v640_v9 }
  0x2b   : > { %587 = vmatpush3.bf16.msra.mxu0 %v641_v10 }
  0x2c   : > { %588 = vmatprep.subr.bf16.mxu0 %v642_v11 }
  0x2f   : > { %589 = vmatpush3.bf16.msra.mxu0 %v643_v14 }
  0x30   : > { %590 = vmatprep.subr.bf16.mxu0 %v644_v15 }
  0x33   : > { %591 = vmatpush3.bf16.msra.mxu0 %v645_v16 }
  0x34   : > { %592 = vmatprep.subr.bf16.mxu0 %v646_v17 }
  0x37   : > { %593 = vmatpush3.bf16.msra.mxu0 %v647_v18 }
  0x3a   : > { %423 = vmatmul.mubr.bf16.vlgmr.msra.gmra.mrb[0].mxu0 %v555_v19 }
 0x10d   : > { %v594_v20 = vpop.f32.mrb[0].mxu0  ;;  %436 = sbr.rel (%p573_p7) target bundleno = 288 (0x120), region = 40 }
 0x10e   : > { %v595_v22 = vpop.f32.mrb[1].mxu0 }
 0x10f   : > { %v596_v23 = vadd.f32 %v595_v22, %v594_v20  ;;  %v597_v24 = vpop.f32.mrb[2].mxu0 }
 0x110   : > { %v598_v25 = vpop.f32.mrb[3].mxu0 }
 0x111   : > { %v430_v26 = vadd.f32 %v596_v23, %v253_v21 }
 0x113   : > { %432 = vst.msk [vmem:[#allocation2] sm:$0xff] %vm431_vm1, %v430_v26 }
 0x11a   : > { %v437_v32 = vld [vmem:[#allocation2] sm:$0xff] }
 0x11b   : > { %v444_v34 = vadd.f32 %v443_v33, %v437_v32 }
 0x11d   : > { %v445_v35 = vpack.c.bf16 %v444_v34, %v444_v34 }
 0x11f   : > { %447 = vst.msk [vmem:[#allocation3] sm:$0xf] %vm446_vm2, %v445_v35 }
 0x120 PF: > { %p780_p8 = scmp.eq.s32.totalorder %s545_s15, 2  ;;  %s705_s30 = smov [#allocation3]  }
 0x121   : > { %s458_s4 = sshll.u32 %s705_s30, 4  ;;  %s459_s4 = int_to_ptr.vmem [resolvable:$true] %s458_s4 }
 0x122   : > { %s650_s5 = scalar_lea.vmem %s459_s4, 64  ;;  %p657_p12 = scmp.lt.s32.totalorder %s459_s4, %s459_s4 }
 0x123   : > { %p651_p9 = scmp.ne.s32.totalorder %s459_s4, %s650_s5  ;;  %p658_p13 = scmp.lt.s32.totalorder %s650_s5, %s650_s5 }
 0x125   : > { %p652_p10 = pnand %p651_p9, %p780_p8  ;;  %p659_p0 = por %p658_p13, %p657_p12 }
 0x127   : > { %p653_p11 = pneg %p652_p10 }
 0x129   : > { %p660_p1 = pnand %p659_p0, %p653_p11 }
 0x12b   : > { %663 = shalt.err (!%p660_p1)
}
 0x12c   : > { %s664_s8 = scalar_lea.hbm %s818_s3, 64 }
 0x12d   : > { %p665_p2 = scmp.ne.s32.totalorder %s818_s3, %s664_s8  ;;  %p670_p5 = scmp.lt.u32.totalorder %s664_s8, %s818_s3 }
 0x12f   : > { %p666_p3 = pnand %p665_p2, %p780_p8 }
 0x131   : > { %p667_p4 = pneg %p666_p3 }
 0x133   : > { %p672_p6 = pnand %p670_p5, %p667_p4 }
 0x135   : > { %675 = shalt.err (!%p672_p6)
}
 0x136   : > { %601 = dma.vmem_to_hbm [thread:$0]  (%p780_p8), %s459_s4, 64, %s818_s3, [#allocation4]  }
 0x137   : > { %689 = dma.done.wait (%p780_p8), [#allocation4], 64  }
 0x138   : > { %691 = vsyncadd (%p780_p8), [#allocation4], 4294967232 }
 0x139 PF: > { %s14_s14 = sadd.s32 1, %s702_s14   ;;  %s820_s12 = smov %s698_s13 }
 0x13a   : > { %p11_p7 = scmp.ge.s32.totalorder %s14_s14, 5   ;;  %s821_s13 = smov %s823_s16 }
 0x13c   :  { %13 = sbr.rel (!%p11_p7) target bundleno = 2 (0x2), region = 74 }
 0x143   :  { %471 = vsyncpa [#allocation4], 1 }
 0x144   :  { %473 = vsyncpa [#allocation4 + $0x1], 1 }

</bundles_post_ra>
